<compile_context>
chip_gen: v5e
topology: v5e:2x2
jax: 0.10.0
libtpu: 0.0.40
codegen_flags: <defaults>
</compile_context>

<pallas_src>
import jax
import jax.numpy as jnp
from jax.experimental import pallas as pl
from jax.experimental.pallas import tpu as pltpu


def mlp_kernel(x_ref, w1_ref, b1_ref, w2_ref, b2_ref, o_ref):
    # Cast streamed x tile to the MXU-native dtype in VMEM (VPU op) -- avoids a
    # wrapper-side XLA convert pass over x in HBM.
    x = x_ref[...].astype(w1_ref.dtype)
    # fc1 on the MXU: bf16 operands, f32 accumulation.
    h = jnp.dot(x, w1_ref[...], preferred_element_type=jnp.float32)
    # bias + ReLU on the VPU in f32 (v5e VPU has no bf16).
    h = jnp.maximum(h + b1_ref[...], 0.0)                       # (tb, H) f32
    # fc2 with out_features == 1: VPU multiply + cross-lane (XLU) reduction,
    # keeping the MXU result path free of a wasteful N=1 matmul.
    o_ref[...] = jnp.sum(h * w2_ref[...], axis=-1, keepdims=True) + b2_ref[...]


def prepare_params(w1, b1, w2, b2, compute_dtype=jnp.bfloat16):
    """One-time conversion from torch nn.Linear layout to kernel layout.

    w1: [H, D], b1: [H], w2: [1, H], b2: [1]  (torch y = x W^T + b semantics)
    Returns (w1_t [D,H] bf16, b1 [1,H] f32, w2 [1,H] f32, b2 [1,1] f32).
    """
    assert w2.shape[0] == 1, "fc2 reduction path assumes output_dim == 1"
    w1_t = jnp.asarray(w1).T.astype(compute_dtype)               # (D, H)
    b1_row = jnp.asarray(b1, jnp.float32).reshape(1, -1)         # (1, H)
    w2_row = jnp.asarray(w2, jnp.float32).reshape(1, -1)         # (1, H)
    b2_sc = jnp.asarray(b2, jnp.float32).reshape(1, 1)           # (1, 1)
    return w1_t, b1_row, w2_row, b2_sc


def teacher_model1_forward(x, params, *, tile_b=2048):
    """x: [B, D] (any float dtype); params from prepare_params. Returns [B, 1] f32."""
    w1_t, b1_row, w2_row, b2_sc = params
    B, D = x.shape
    H = w1_t.shape[1]

    # Batch tile: multiple of 8 (sublane), no bigger than the (rounded-up) batch.
    tile_b = max(8, (int(tile_b) // 8) * 8)
    tb = min(tile_b, ((B + 7) // 8) * 8)
    grid = (pl.cdiv(B, tb),)

    # Explicit scoped-VMEM budget: double-buffered x/out tiles + resident
    # weights, 32 MiB floor (v5e default scoped VMEM is 16 MiB), capped well
    # under v7x's 64 MiB physical VMEM.
    block_bytes = (tb * D * x.dtype.itemsize            # x tile
                   + tb * 4                             # out tile (f32)
                   + D * H * w1_t.dtype.itemsize        # w1 (resident)
                   + (2 * H + 1) * 4)                   # b1, w2, b2
    vmem_limit = int(min(56 * 1024 * 1024,
                         max(32 * 1024 * 1024, 6 * block_bytes)))

    cost = pl.CostEstimate(
        flops=int(2 * B * D * H + 4 * B * H),            # fc1 matmul + bias/relu/fc2
        transcendentals=0,
        bytes_accessed=int(B * D * x.dtype.itemsize
                           + D * H * w1_t.dtype.itemsize
                           + (2 * H + 1) * 4 + B * 4),
    )

    # TODO(synk): if D grows to several thousand, add a K ("arbitrary") grid axis
    # with an f32 VMEM accumulator + pl.when init/finalize to stay within VMEM.
    out = pl.pallas_call(
        mlp_kernel,
        out_shape=jax.ShapeDtypeStruct((B, 1), jnp.float32),
        grid=grid,
        in_specs=[
            pl.BlockSpec((tb, D), lambda i: (i, 0)),     # x: streamed per tile
            pl.BlockSpec((D, H), lambda i: (0, 0)),      # w1^T: resident
            pl.BlockSpec((1, H), lambda i: (0, 0)),      # b1: resident
            pl.BlockSpec((1, H), lambda i: (0, 0)),      # w2 row: resident
            pl.BlockSpec((1, 1), lambda i: (0, 0)),      # b2: resident
        ],
        out_specs=pl.BlockSpec((tb, 1), lambda i: (i, 0)),
        compiler_params=pltpu.CompilerParams(
            dimension_semantics=("parallel",),           # shard batch tiles across TCs
            vmem_limit_bytes=vmem_limit,
        ),
        cost_estimate=cost,
    )(x, w1_t, b1_row, w2_row, b2_sc)

    return out


def init_params(key, input_dim, output_dim, hidden=128):
    """Deterministic init mimicking nn.Linear default (uniform +/- 1/sqrt(fan_in))."""
    k1, k2, k3, k4 = jax.random.split(key, 4)
    bound1 = 1.0 / jnp.sqrt(input_dim)
    bound2 = 1.0 / jnp.sqrt(hidden)
    w1 = jax.random.uniform(k1, (hidden, input_dim), jnp.float32, -bound1, bound1)
    b1 = jax.random.uniform(k2, (hidden,), jnp.float32, -bound1, bound1)
    w2 = jax.random.uniform(k3, (output_dim, hidden), jnp.float32, -bound2, bound2)
    b2 = jax.random.uniform(k4, (output_dim,), jnp.float32, -bound2, bound2)
    return w1, b1, w2, b2


if __name__ == "__main__":
    key = jax.random.PRNGKey(0)
    k_x, k_p, k_x2 = jax.random.split(key, 3)

    batch, input_dim, output_dim, hidden = 16, 32, 1, 128
    x = jax.random.normal(k_x, (batch, input_dim), jnp.float32)
    w1, b1, w2, b2 = init_params(k_p, input_dim, output_dim, hidden)
    params = prepare_params(w1, b1, w2, b2)

    out = jax.block_until_ready(teacher_model1_forward(x, params))
    assert out.shape == (batch, output_dim)

    # Reference with the same bf16 fc1 operands (tight check of kernel math).
    def ref_fn(xx):
        h = jnp.dot(xx.astype(jnp.bfloat16), w1.T.astype(jnp.bfloat16),
                    preferred_element_type=jnp.float32) + b1
        return jnp.maximum(h, 0.0) @ w2.T + b2

    assert jnp.allclose(out, ref_fn(x), atol=1e-3, rtol=1e-3)

    # Pure-f32 torch-semantics reference: bf16 fc1 error is tiny at these scales.
    ref32 = jnp.maximum(x @ w1.T + b1, 0.0) @ w2.T + b2
    assert jnp.allclose(out, ref32, atol=1e-1, rtol=1e-1)

    # Exercise the multi-tile + ragged (masked trailing block) path:
    # B=20 with 8-row tiles -> grid of 3, last block half-masked.
    x2 = jax.random.normal(k_x2, (20, input_dim), jnp.float32)
    out2 = jax.block_until_ready(teacher_model1_forward(x2, params, tile_b=8))
    assert out2.shape == (20, output_dim)
    assert jnp.allclose(out2, ref_fn(x2), atol=1e-3, rtol=1e-3)

    print("KERNEL_OK")
</pallas_src>

<mosaic_0001>
module attributes {stable_mosaic.version = 11 : i64} {
  func.func @mlp_kernel(%arg0: i32, %arg1: memref<16x32xf32, #tpu.memory_space<vmem>>, %arg2: memref<32x128xbf16, #tpu.memory_space<vmem>>, %arg3: memref<1x128xf32, #tpu.memory_space<vmem>>, %arg4: memref<1x128xf32, #tpu.memory_space<vmem>>, %arg5: memref<1x1xf32, #tpu.memory_space<vmem>>, %arg6: memref<16x1xf32, #tpu.memory_space<vmem>>) attributes {dimension_semantics = [#tpu.dimension_semantics<parallel>], iteration_bounds = array<i64: 1>, scalar_prefetch = 0 : i64, scratch_operands = 0 : i64, tpu.core_type = #tpu.core_type<tc>, window_params = [{transform_indices = @transform_0, window_bounds = array<i64: 16, 32>}, {pipeline_mode = #tpu.pipeline_mode<synchronous>, transform_indices = @transform_1, window_bounds = array<i64: 32, 128>}, {pipeline_mode = #tpu.pipeline_mode<synchronous>, transform_indices = @transform_2, window_bounds = array<i64: 1, 128>}, {pipeline_mode = #tpu.pipeline_mode<synchronous>, transform_indices = @transform_3, window_bounds = array<i64: 1, 128>}, {pipeline_mode = #tpu.pipeline_mode<synchronous>, transform_indices = @transform_4, window_bounds = array<i64: 1, 1>}, {transform_indices = @transform_5, window_bounds = array<i64: 16, 1>}]} {
    %c0 = arith.constant 0 : index
    %c0_0 = arith.constant 0 : index
    %0 = vector.load %arg1[%c0, %c0_0] : memref<16x32xf32, #tpu.memory_space<vmem>>, vector<16x32xf32>
    %1 = arith.truncf %0 : vector<16x32xf32> to vector<16x32xbf16>
    %c0_1 = arith.constant 0 : index
    %c0_2 = arith.constant 0 : index
    %2 = vector.load %arg2[%c0_1, %c0_2] : memref<32x128xbf16, #tpu.memory_space<vmem>>, vector<32x128xbf16>
    %cst = arith.constant dense<0.000000e+00> : vector<16x128xf32>
    %3 = tpu.matmul %1, %2, %cst {dimension_numbers = #tpu.dot_dimension_numbers<[1], [0], [0], [1], [0, 0, 1, 1], [], []>} : vector<16x32xbf16>, vector<32x128xbf16>, vector<16x128xf32> -> vector<16x128xf32>
    %c0_3 = arith.constant 0 : index
    %c0_4 = arith.constant 0 : index
    %4 = vector.load %arg3[%c0_3, %c0_4] : memref<1x128xf32, #tpu.memory_space<vmem>>, vector<1x128xf32>
    %5 = vector.broadcast %4 : vector<1x128xf32> to vector<16x128xf32>
    %6 = arith.addf %3, %5 : vector<16x128xf32>
    %cst_5 = arith.constant 0.000000e+00 : f32
    %7 = vector.broadcast %cst_5 : f32 to vector<16x128xf32>
    %8 = arith.maximumf %6, %7 : vector<16x128xf32>
    %c0_6 = arith.constant 0 : index
    %c0_7 = arith.constant 0 : index
    %9 = vector.load %arg4[%c0_6, %c0_7] : memref<1x128xf32, #tpu.memory_space<vmem>>, vector<1x128xf32>
    %10 = vector.broadcast %9 : vector<1x128xf32> to vector<16x128xf32>
    %11 = arith.mulf %8, %10 : vector<16x128xf32>
    %cst_8 = arith.constant dense<0.000000e+00> : vector<16xf32>
    %12 = vector.multi_reduction <add>, %11, %cst_8 [1] : vector<16x128xf32> to vector<16xf32>
    %13 = vector.shape_cast %12 : vector<16xf32> to vector<16x1xf32>
    %c0_9 = arith.constant 0 : index
    %c0_10 = arith.constant 0 : index
    %14 = vector.load %arg5[%c0_9, %c0_10] : memref<1x1xf32, #tpu.memory_space<vmem>>, vector<1x1xf32>
    %15 = vector.broadcast %14 : vector<1x1xf32> to vector<16x1xf32>
    %16 = arith.addf %13, %15 : vector<16x1xf32>
    %c0_11 = arith.constant 0 : index
    %c0_12 = arith.constant 0 : index
    %17 = vector.load %arg6[%c0_11, %c0_12] : memref<16x1xf32, #tpu.memory_space<vmem>>, vector<16x1xf32>
    tpu.vector_store %arg6[%c0_11, %c0_12], %16 {strides = array<i32>} : memref<16x1xf32, #tpu.memory_space<vmem>>, vector<16x1xf32>,
    return
  }
  func.func @transform_0(%arg0: i32) -> (i32, i32) {
    %c0_i32 = arith.constant 0 : i32
    %c0_i32_0 = arith.constant 0 : i32
    return %arg0, %c0_i32 : i32, i32
  }
  func.func @transform_1(%arg0: i32) -> (i32, i32) {
    %c0_i32 = arith.constant 0 : i32
    %c0_i32_0 = arith.constant 0 : i32
    %c0_i32_1 = arith.constant 0 : i32
    return %c0_i32, %c0_i32_0 : i32, i32
  }
  func.func @transform_2(%arg0: i32) -> (i32, i32) {
    %c0_i32 = arith.constant 0 : i32
    %c0_i32_0 = arith.constant 0 : i32
    %c0_i32_1 = arith.constant 0 : i32
    return %c0_i32, %c0_i32_0 : i32, i32
  }
  func.func @transform_3(%arg0: i32) -> (i32, i32) {
    %c0_i32 = arith.constant 0 : i32
    %c0_i32_0 = arith.constant 0 : i32
    %c0_i32_1 = arith.constant 0 : i32
    return %c0_i32, %c0_i32_0 : i32, i32
  }
  func.func @transform_4(%arg0: i32) -> (i32, i32) {
    %c0_i32 = arith.constant 0 : i32
    %c0_i32_0 = arith.constant 0 : i32
    %c0_i32_1 = arith.constant 0 : i32
    return %c0_i32, %c0_i32_0 : i32, i32
  }
  func.func @transform_5(%arg0: i32) -> (i32, i32) {
    %c0_i32 = arith.constant 0 : i32
    %c0_i32_0 = arith.constant 0 : i32
    return %arg0, %c0_i32 : i32, i32
  }
}

</mosaic_0001>

<bundles_post_ra>
// kernel: tpu_custom_call.1
= control target key start
LH: loop header
LB: loop body
LE: loop exit
PB: predicated region body
PF: predicated region fallthrough
CT: control target
= control target key end

     0   :  { %s252_s0 = inlined_call_operand.hbm [shape: f32[16,32], index: 0, kind: input, shape index: {}]   ;;  %s253_s1 = inlined_call_operand.hbm [shape: bf16[32,128], index: 1, kind: input, shape index: {}]   ;;  %s254_s2 = inlined_call_operand.vmem [shape: f32[1,128], index: 2, kind: input, shape index: {}]   ;;  %s255_s3 = inlined_call_operand.vmem [shape: f32[1,128], index: 3, kind: input, shape index: {}]   ;;  %s256_s4 = inlined_call_operand.<no memory space> [shape: f32[1,1], index: 4, kind: input, shape index: {}]   ;;  %s257_s5 = inlined_call_operand.vmem [shape: f32[16,1], index: 5, kind: output, shape index: {}]  }
   0x1   :  { %v10_v0 = vstv %s256_s4 }
   0x2   :  { %11 = vst [vmem:[#allocation2] sm:$0x1] %v10_v0 }
   0x3   :  { %12 = vsyncpa [#allocation4], 0  ;;  %s18_s22 = sshll.u32 %s252_s0, 4  ;;  %s19_s22 = int_to_ptr.hbm [resolvable:$true] %s18_s22 }
   0x4   :  { %13 = vsyncpa [#allocation6], 0  ;;  %s195_s23 = smov [#allocation3]   ;;  %s31_s27 = sshll.u32 %s253_s1, 4  ;;  %s32_s27 = int_to_ptr.hbm [resolvable:$true] %s31_s27 }
   0x5   :  { %s20_s24 = sshll.u32 %s195_s23, 4  ;;  %s196_s28 = smov 128   ;;  %s21_s24 = int_to_ptr.vmem [resolvable:$true] %s20_s24 }
   0x6   :  { %s197_s29 = smov 8   ;;  %s198_s4 = smov [#allocation5]  }
   0x7   :  { %26 = dma.hbm_to_vmem [thread:$0]  %s19_s22, 256, %s21_s24, [#allocation4], %s196_s28, %s196_s28, %s197_s29  }
   0x8   :  { %s33_s30 = sshll.u32 %s198_s4, 4  ;;  %s199_s6 = smov 64   ;;  %s34_s30 = int_to_ptr.vmem [resolvable:$true] %s33_s30 }
   0x9   :  { %s200_s7 = smov 4  }
   0xa   :  { %39 = dma.hbm_to_vmem [thread:$0]  %s32_s27, 256, %s34_s30, [#allocation6], %s199_s6, %s199_s6, %s200_s7  }
   0xb   :  { %191 = dma.done.wait [#allocation4], 256  }
   0xc   :  { %192 = vsyncadd [#allocation4], 4294967040 }
   0xd   :  { %193 = dma.done.wait [#allocation6], 256  }
   0xe   :  { %194 = vsyncadd [#allocation6], 4294967040  ;;  %v133_v1 = vld [vmem:[#allocation5 + $0x8] sm:$0xff]  ;;  %v132_v2 = vld [vmem:[#allocation5] sm:$0xff]  ;;  %vm78_vm0 = vcmask 261120   ;;  %vm114_vm1 = vcmask 7168  }
   0xf   :  { %v55_v3 = vld [vmem:[#allocation3] sm:$0xff]  ;;  %88 = vmatpush.bf16.msra.mxu0 %v133_v1  ;;  %v56_v4 = vld [vmem:[#allocation3 + $0x8] sm:$0xff]  ;;  %v140_v6 = vld [vmem:[%s254_s2] ss:$0 sm:$0xff] }
  0x10   :  { %v57_v5 = vpack.c.bf16 %v56_v4, %v55_v3  ;;  %v141_v9 = vld [vmem:[%s255_s3] ss:$0 sm:$0xff] }
  0x11   :  { %v142_v16 = vld [vmem:[#allocation2] ss:$0 sm:$0xff] }
  0x13   :  { %89 = vmatpush.bf16.msra.mxu0 %v132_v2 }
  0x16   :  { %131 = vmatmul.msk.bf16.vlgmr.msra.gmra.mxu0 %vm78_vm0, %v57_v5 }
  0x93   :  { %v91_v7 = vpop.f32.mrf.mxu0 }
  0x94   :  { %v92_v8 = vadd.f32 %v140_v6, %v91_v7 }
  0x96   :  { %v96_v10 = vmax.f32 %v92_v8, 0.0 }
  0x98   :  { %v102_v11 = vmul.f32 %v141_v9, %v96_v10 }
  0x9a   :  { %104 = vadd.xlane.f32.xlu0 %v102_v11 }
  0x9b   :  { %v93_v12 = vpop.f32.mrf.mxu0 }
  0x9c   :  { %v94_v13 = vadd.f32 %v140_v6, %v93_v12 }
  0x9e   :  { %v97_v14 = vmax.f32 %v94_v13, 0.0 }
  0xa0   :  { %v103_v15 = vmul.f32 %v141_v9, %v97_v14 }
  0xa2   :  { %106 = vadd.xlane.f32.xlu0 %v103_v15 }
 0x10d   :  { %v105_v17 = vpop.xlane.xlu0 %104 }
 0x10e   :  { %v112_v18 = vadd.f32 %v142_v16, %v105_v17 }
 0x110   :  { %115 = vst.msk [vmem:[%s257_s5] sm:$0xff] %vm114_vm1, %v112_v18 }
 0x115   :  { %v107_v19 = vpop.xlane.xlu0 %106 }
 0x116   :  { %v113_v20 = vadd.f32 %v142_v16, %v107_v19 }
 0x118   :  { %116 = vst.msk [vmem:[%s257_s5 + $0x8] sm:$0xff] %vm114_vm1, %v113_v20 }
 0x119   :  { %121 = vsyncpa [#allocation4], 1 }
 0x11a   :  { %122 = vsyncpa [#allocation6], 1 }

</bundles_post_ra>
